<compile_context>
chip_gen: v6e
topology: v6e:2x2x1
jax: 0.10.0
libtpu: 0.0.40
codegen_flags: <defaults>
</compile_context>

<pallas_src>
import functools

import jax
import jax.numpy as jnp
from jax.experimental import pallas as pl
from jax.experimental.pallas import tpu as pltpu


def _round_up(n: int, m: int) -> int:
    return ((n + m - 1) // m) * m


# ---------------------------------------------------------------------------
# Prologue kernel: h = tanh(x @ W1^T), computed ONCE per batch tile
# (hoisted out of the label sweep).
# ---------------------------------------------------------------------------
def _h_kernel(x_ref, w1t_ref, h_ref):
    h = jnp.tanh(
        jnp.einsum("bsi,ip->bsp", x_ref[...], w1t_ref[...],
                   preferred_element_type=jnp.float32))
    h_ref[...] = h.astype(h_ref.dtype)


# ---------------------------------------------------------------------------
# Main kernel: one (batch-tile, label-tile) block of the LAAT head.
#   grid = (batch outer "parallel", label inner "parallel").
#   x / h block indices depend only on the outer axis -> VMEM-resident across
#   the label sweep.  drug_rep is a per-batch-tile partial sum, written
#   exactly once per grid point (no cross-step accumulator needed).
# ---------------------------------------------------------------------------
def _laat_kernel(x_ref, h_ref, w2t_ref, w3_ref, b3_ref,
                 logits_ref, drug_ref, *, mm_dtype):
    # attention scores for this label tile: a = h @ W2^T          [TB, S, TC]
    a = jnp.einsum("bsp,pc->bsc", h_ref[...], w2t_ref[...],
                   preferred_element_type=jnp.float32)

    # softmax over the sequence axis (dim=1); EUP reciprocal, no vector divide
    # TODO(synk): chunk S with a flash-style online softmax when the
    # [TB, S, TC] f32 intermediates no longer fit VMEM (very long documents).
    a_max = jnp.max(a, axis=1, keepdims=True)
    e = jnp.exp(a - a_max)
    att = e * pl.reciprocal(jnp.sum(e, axis=1, keepdims=True), approx=True)

    # weighted_output = att^T @ x per batch: batched contraction over S;
    # no explicit [S,C]->[C,S] transpose is materialized.         [TB, TC, I]
    weighted = jnp.einsum("bsc,bsi->bci", att.astype(mm_dtype), x_ref[...],
                          preferred_element_type=jnp.float32)

    # logits = sum(W3 * weighted, -1) + b3 ; W3 / b3 stay f32 (never feed MXU)
    logits_ref[...] = jnp.sum(w3_ref[...] * weighted, axis=2) + b3_ref[...]

    # per-batch-tile partial sum of weighted_output; the mean over the batch
    # is finished in the wrapper.                                  [1, TC, I]
    drug_ref[...] = jnp.sum(weighted, axis=0, keepdims=True)


def label_attention(x, w1, w2, w3, b3, *,
                    block_b: int = 8, block_c: int = 256,
                    matmul_dtype=jnp.bfloat16,
                    vmem_limit_bytes=None):
    """LAAT forward.  x:[B,S,I], w1:[P,I], w2:[C,P], w3:[C,I], b3:[C].

    Returns (logits [B,C], drug_rep [C,I]), both float32.
    """
    B, S, I = x.shape
    P = w1.shape[0]
    C = w2.shape[0]
    assert block_b % 8 == 0, "batch tile must be a multiple of 8 (sublane)"
    assert block_c % 128 == 0, "label tile must be lane-aligned (mult of 128)"

    f32 = jnp.float32
    mmd = jnp.dtype(matmul_dtype)
    mm_bytes = mmd.itemsize

    # ---- tiling -----------------------------------------------------------
    tb = min(block_b, _round_up(B, 8))          # sublane-dense batch tile
    b_pad = _round_up(B, tb)
    c_128 = _round_up(C, 128)
    tc = min(block_c, c_128)                    # lane-dense label tile
    c_pad = _round_up(c_128, tc)
    nb = b_pad // tb
    nc = c_pad // tc

    # ---- operand prep -----------------------------------------------------
    # Only pad-copy x when the batch is ragged; otherwise feed it directly
    # (the dtype cast, if any, is the unavoidable one-time conversion).
    x_mm = x if x.dtype == mmd else x.astype(mmd)
    if b_pad != B:
        x_p = jnp.zeros((b_pad, S, I), mmd).at[:B].set(x_mm)
    else:
        x_p = x_mm

    w1t = jnp.asarray(w1, mmd).T                                    # [I, P]
    w2t = jnp.zeros((P, c_pad), mmd).at[:, :C].set(jnp.asarray(w2, mmd).T)
    # W3 / b3 never feed the MXU -> keep f32 (no in-kernel cast, no precision
    # loss in the logits epilogue).
    w3_p = jnp.zeros((c_pad, I), f32).at[:C].set(jnp.asarray(w3, f32))
    b3_p = jnp.zeros((1, c_pad), f32).at[0, :C].set(jnp.asarray(b3, f32))

    # ---- VMEM budget derived from the actual tile sizes --------------------
    if vmem_limit_bytes is None:
        est = (
            2 * tb * S * I * mm_bytes        # x block (double buffered)
            + 2 * tb * S * P * mm_bytes      # h block
            + 2 * P * tc * mm_bytes          # W2^T tile
            + 2 * tc * I * 4                 # W3 tile (f32)
            + 2 * tc * 4                     # b3 tile
            + 2 * tb * tc * 4                # logits tile
            + 2 * tc * I * 4                 # drug partial tile
            + 2 * tb * S * tc * 4            # a / att intermediates (f32)
            + tb * tc * I * 4                # weighted intermediate (f32)
        )
        vmem_limit_bytes = min(int(est * 1.25) + (8 << 20), 100 << 20)

    # ---- prologue: h = tanh(x @ W1^T) once per batch tile -------------------
    h_vmem = min(
        int(1.25 * (2 * tb * S * I * mm_bytes + 2 * I * P * mm_bytes
                    + 2 * tb * S * P * mm_bytes + tb * S * P * 4)) + (8 << 20),
        100 << 20)
    h = pl.pallas_call(
        _h_kernel,
        out_shape=jax.ShapeDtypeStruct((b_pad, S, P), mmd),
        grid_spec=pltpu.PrefetchScalarGridSpec(
            num_scalar_prefetch=0,
            grid=(nb,),
            in_specs=[
                pl.BlockSpec((tb, S, I), lambda b: (b, 0, 0)),
                pl.BlockSpec((I, P), lambda b: (0, 0)),
            ],
            out_specs=pl.BlockSpec((tb, S, P), lambda b: (b, 0, 0)),
        ),
        compiler_params=pltpu.CompilerParams(
            dimension_semantics=("parallel",),
            vmem_limit_bytes=h_vmem,
        ),
    )(x_p, w1t)

    # ---- main LAAT kernel ---------------------------------------------------
    kernel = functools.partial(_laat_kernel, mm_dtype=mmd)
    logits_p, drug_part = pl.pallas_call(
        kernel,
        out_shape=(
            jax.ShapeDtypeStruct((b_pad, c_pad), f32),
            jax.ShapeDtypeStruct((nb, c_pad, I), f32),
        ),
        grid_spec=pltpu.PrefetchScalarGridSpec(
            num_scalar_prefetch=0,
            # batch OUTER so x / h stay VMEM-resident across the label sweep.
            grid=(nb, nc),
            in_specs=[
                pl.BlockSpec((tb, S, I), lambda b, c: (b, 0, 0)),   # x
                pl.BlockSpec((tb, S, P), lambda b, c: (b, 0, 0)),   # h
                pl.BlockSpec((P, tc), lambda b, c: (0, c)),         # W2^T
                pl.BlockSpec((tc, I), lambda b, c: (c, 0)),         # W3
                pl.BlockSpec((1, tc), lambda b, c: (0, c)),         # b3
            ],
            out_specs=[
                pl.BlockSpec((tb, tc), lambda b, c: (b, c)),        # logits
                pl.BlockSpec((1, tc, I), lambda b, c: (b, c, 0)),   # drug part
            ],
        ),
        compiler_params=pltpu.CompilerParams(
            # Every output block is written exactly once -> both axes are
            # parallel-safe (megacore shards either on v7x).
            dimension_semantics=("parallel", "parallel"),
            vmem_limit_bytes=vmem_limit_bytes,
        ),
    )(x_p, h, w2t, w3_p, b3_p)

    logits = logits_p[:B, :C]
    drug_rep = (jnp.sum(drug_part, axis=0) * (1.0 / B))[:C]
    return logits, drug_rep


def label_attention_ref(x, w1, w2, w3, b3):
    # Pure-JAX f32 reference mirroring the PyTorch forward.
    h = jnp.tanh(jnp.einsum("bsi,pi->bsp", x, w1))
    a = jnp.einsum("bsp,cp->bsc", h, w2)
    att = jax.nn.softmax(a, axis=1)                     # softmax over seq
    weighted = jnp.einsum("bsc,bsi->bci", att, x)       # [B, C, I]
    logits = jnp.sum(w3[None] * weighted, axis=2) + b3[None]
    drug_rep = jnp.mean(weighted, axis=0)
    return logits, drug_rep


if __name__ == "__main__":
    # Small shapes consistent with the module's forward.
    B, S, I, P, C = 2, 8, 32, 16, 8

    key = jax.random.PRNGKey(0)
    kx, k1, k2, k3, kb = jax.random.split(key, 5)
    x = jax.random.normal(kx, (B, S, I), dtype=jnp.float32)
    # _init_weights: normal(mean=0, std=0.03) on all three linear weights.
    w1 = 0.03 * jax.random.normal(k1, (P, I), dtype=jnp.float32)
    w2 = 0.03 * jax.random.normal(k2, (C, P), dtype=jnp.float32)
    w3 = 0.03 * jax.random.normal(k3, (C, I), dtype=jnp.float32)
    b3 = 0.03 * jax.random.normal(kb, (C,), dtype=jnp.float32)

    ref_logits, ref_drug = label_attention_ref(x, w1, w2, w3, b3)

    # f32 matmul path (tight tolerance; only the EUP approximate reciprocal in
    # the softmax normalization differs from the reference).
    logits, drug = label_attention(x, w1, w2, w3, b3, matmul_dtype=jnp.float32)
    jax.block_until_ready((logits, drug))
    assert logits.shape == (B, C) and drug.shape == (C, I)
    assert jnp.allclose(logits, ref_logits, atol=5e-3, rtol=5e-3)
    assert jnp.allclose(drug, ref_drug, atol=5e-3, rtol=5e-3)

    # Default bf16-MXU path (production default).
    logits_bf, drug_bf = label_attention(x, w1, w2, w3, b3)
    jax.block_until_ready((logits_bf, drug_bf))
    assert jnp.allclose(logits_bf, ref_logits, atol=2e-2, rtol=2e-2)
    assert jnp.allclose(drug_bf, ref_drug, atol=2e-2, rtol=2e-2)

    # Multi-tile path: ragged batch (2 batch tiles) and 2 label tiles —
    # exercises the per-batch-tile drug partial sums and padded-label slicing.
    B2, C2 = 9, 136
    kx2, k22, k32, kb2 = jax.random.split(jax.random.PRNGKey(1), 4)
    x2 = jax.random.normal(kx2, (B2, S, I), dtype=jnp.float32)
    w22 = 0.03 * jax.random.normal(k22, (C2, P), dtype=jnp.float32)
    w32 = 0.03 * jax.random.normal(k32, (C2, I), dtype=jnp.float32)
    b32 = 0.03 * jax.random.normal(kb2, (C2,), dtype=jnp.float32)
    ref_l2, ref_d2 = label_attention_ref(x2, w1, w22, w32, b32)
    l2, d2 = label_attention(x2, w1, w22, w32, b32,
                             matmul_dtype=jnp.float32, block_c=128)
    jax.block_until_ready((l2, d2))
    assert l2.shape == (B2, C2) and d2.shape == (C2, I)
    assert jnp.allclose(l2, ref_l2, atol=5e-3, rtol=5e-3)
    assert jnp.allclose(d2, ref_d2, atol=5e-3, rtol=5e-3)

    print("KERNEL_OK")
</pallas_src>

<mosaic_0001>
module attributes {stable_mosaic.version = 11 : i64} {
  func.func @_h_kernel(%arg0: i32, %arg1: memref<8x8x32xf32, #tpu.memory_space<vmem>>, %arg2: memref<32x16xf32, #tpu.memory_space<vmem>>, %arg3: memref<8x8x16xf32, #tpu.memory_space<vmem>>) attributes {dimension_semantics = [#tpu.dimension_semantics<parallel>], iteration_bounds = array<i64: 1>, scalar_prefetch = 0 : i64, scratch_operands = 0 : i64, tpu.core_type = #tpu.core_type<tc>, window_params = [{transform_indices = @transform_0, window_bounds = array<i64: 8, 8, 32>}, {pipeline_mode = #tpu.pipeline_mode<synchronous>, transform_indices = @transform_1, window_bounds = array<i64: 32, 16>}, {transform_indices = @transform_2, window_bounds = array<i64: 8, 8, 16>}]} {
    %c0 = arith.constant 0 : index
    %c0_0 = arith.constant 0 : index
    %c0_1 = arith.constant 0 : index
    %0 = vector.load %arg1[%c0, %c0_0, %c0_1] : memref<8x8x32xf32, #tpu.memory_space<vmem>>, vector<8x8x32xf32>
    %c0_2 = arith.constant 0 : index
    %c0_3 = arith.constant 0 : index
    %1 = vector.load %arg2[%c0_2, %c0_3] : memref<32x16xf32, #tpu.memory_space<vmem>>, vector<32x16xf32>
    "tpu.trace_start"() <{level = 10 : i32, message = "bsi,ip->bsp"}> : () -> ()
    %cst = arith.constant dense<0.000000e+00> : vector<8x8x16xf32>
    %2 = tpu.matmul %0, %1, %cst {dimension_numbers = #tpu.dot_dimension_numbers<[2], [0], [0, 1], [1], [0, 0, 0, 1, 1, 1], [], []>} : vector<8x8x32xf32>, vector<32x16xf32>, vector<8x8x16xf32> -> vector<8x8x16xf32>
    "tpu.trace_stop"() : () -> ()
    %3 = math.tanh %2 : vector<8x8x16xf32>
    %c0_4 = arith.constant 0 : index
    %c0_5 = arith.constant 0 : index
    %c0_6 = arith.constant 0 : index
    %4 = vector.load %arg3[%c0_4, %c0_5, %c0_6] : memref<8x8x16xf32, #tpu.memory_space<vmem>>, vector<8x8x16xf32>
    tpu.vector_store %arg3[%c0_4, %c0_5, %c0_6], %3 {strides = array<i32>} : memref<8x8x16xf32, #tpu.memory_space<vmem>>, vector<8x8x16xf32>,
    return
  }
  func.func @transform_0(%arg0: i32) -> (i32, i32, i32) {
    %c0_i32 = arith.constant 0 : i32
    %c0_i32_0 = arith.constant 0 : i32
    %c0_i32_1 = arith.constant 0 : i32
    return %arg0, %c0_i32, %c0_i32_0 : i32, i32, i32
  }
  func.func @transform_1(%arg0: i32) -> (i32, i32) {
    %c0_i32 = arith.constant 0 : i32
    %c0_i32_0 = arith.constant 0 : i32
    %c0_i32_1 = arith.constant 0 : i32
    return %c0_i32, %c0_i32_0 : i32, i32
  }
  func.func @transform_2(%arg0: i32) -> (i32, i32, i32) {
    %c0_i32 = arith.constant 0 : i32
    %c0_i32_0 = arith.constant 0 : i32
    %c0_i32_1 = arith.constant 0 : i32
    return %arg0, %c0_i32, %c0_i32_0 : i32, i32, i32
  }
}

</mosaic_0001>

<bundles_post_ra>
// kernel: tpu_custom_call.1
= control target key start
LH: loop header
LB: loop body
LE: loop exit
PB: predicated region body
PF: predicated region fallthrough
CT: control target
= control target key end

     0   :  { %7 = vsyncpa [#allocation3], 0  ;;  %s373_s0 = inlined_call_operand.hbm [shape: f32[8,8,32], index: 0, kind: input, shape index: {}]   ;;  %s374_s1 = inlined_call_operand.vmem [shape: f32[32,16], index: 1, kind: input, shape index: {}]   ;;  %s375_s2 = inlined_call_operand.hbm [shape: f32[8,8,16], index: 2, kind: output, shape index: {}]  }
   0x1   :  { %8 = vsyncpa [#allocation4], 0  ;;  %s314_s9 = smov [#allocation2]  }
   0x2   :  { %s14_s10 = sshll.u32 %s314_s9, 4  ;;  %s15_s10 = int_to_ptr.vmem [resolvable:$true] %s14_s10 }
   0x3   :  { %s278_s11 = scalar_lea.vmem %s15_s10, 1024  ;;  %p283_p1 = scmp.lt.s32.totalorder %s15_s10, %s15_s10 }
   0x4   :  { %p279_p0 = scmp.ne.s32.totalorder %s15_s10, %s278_s11  ;;  %p284_p2 = scmp.lt.s32.totalorder %s278_s11, %s278_s11 }
   0x6   :  { %p285_p3 = por %p284_p2, %p283_p1 }
   0x8   :  { %p286_p4 = pnand %p285_p3, %p279_p0 }
   0xa   :  { %289 = shalt.err (!%p286_p4)
}
   0xb   :  { %s315_s12 = smov 128   ;;  %s316_s13 = smov 8  }
   0xc   :  { %20 = dma.hbm_to_vmem [thread:$0]  %s373_s0, 1024, %s15_s10, [#allocation3], %s315_s12, %s315_s12, %s316_s13  }
   0xd   :  { %310 = dma.done.wait [#allocation3], 1024  }
   0xe   :  { %311 = vsyncadd [#allocation3], 4294966272  ;;  %v37_v0 = vld [vmem:[%s374_s1 + $0x18] sm:$0xff]  ;;  %v36_v1 = vld [vmem:[%s374_s1 + $0x10] sm:$0xff]  ;;  %vm38_vm0 = vcmask 261120   ;;  %vm176_vm1 = vcmask 130048  }
   0xf   :  { %222 = vmatprep.subr.mxu0 %v37_v0  ;;  %242 = vmatprep.subr.mxu1 %v37_v0  ;;  %v35_v2 = vld [vmem:[%s374_s1 + $0x8] sm:$0xff]  ;;  %v34_v3 = vld [vmem:[%s374_s1] sm:$0xff]  ;;  %v28_v8 = vld [vmem:[#allocation2 + $0x10] sm:$0xff]  ;;  %s317_s1 = smov [#allocation5]  }
  0x10   :  { %223 = vmatpush3.msra.mxu0 %v37_v0  ;;  %246 = vmatpush3.msra.mxu1 %v37_v0  ;;  %v26_v4 = vld [vmem:[#allocation2] sm:$0xff]  ;;  %v27_v6 = vld [vmem:[#allocation2 + $0x8] sm:$0xff]  ;;  %v32_v9 = vld [vmem:[#allocation2 + $0x30] sm:$0xff]  ;;  %s190_s23 = sshll.u32 %s317_s1, 4  ;;  %s191_s23 = int_to_ptr.vmem [resolvable:$true] %s190_s23 }
  0x11   :  { %224 = vmatprep.subr.mxu0 %v36_v1  ;;  %243 = vmatprep.subr.mxu1 %v36_v1  ;;  %v30_v5 = vld [vmem:[#allocation2 + $0x20] sm:$0xff]  ;;  %v31_v7 = vld [vmem:[#allocation2 + $0x28] sm:$0xff]  ;;  %v29_v10 = vld [vmem:[#allocation2 + $0x18] sm:$0xff]  ;;  %s290_s24 = scalar_lea.vmem %s191_s23, 1024  ;;  %p295_p6 = scmp.lt.s32.totalorder %s191_s23, %s191_s23 }
  0x12   :  { %225 = vmatpush3.msra.mxu0 %v36_v1  ;;  %247 = vmatpush3.msra.mxu1 %v36_v1  ;;  %v33_v11 = vld [vmem:[#allocation2 + $0x38] sm:$0xff]  ;;  %p291_p5 = scmp.ne.s32.totalorder %s191_s23, %s290_s24  ;;  %p296_p7 = scmp.lt.s32.totalorder %s290_s24, %s290_s24 }
  0x13   :  { %226 = vmatprep.subr.mxu0 %v35_v2  ;;  %244 = vmatprep.subr.mxu1 %v35_v2 }
  0x14   :  { %227 = vmatpush3.msra.mxu0 %v35_v2  ;;  %248 = vmatpush3.msra.mxu1 %v35_v2  ;;  %p297_p8 = por %p296_p7, %p295_p6 }
  0x15   :  { %228 = vmatprep.subr.mxu0 %v34_v3  ;;  %245 = vmatprep.subr.mxu1 %v34_v3 }
  0x16   :  { %229 = vmatpush3.msra.mxu0 %v34_v3  ;;  %249 = vmatpush3.msra.mxu1 %v34_v3  ;;  %p298_p9 = pnand %p297_p8, %p291_p5 }
  0x17   :  { %230 = vmatprep.mubr.msk.f32.mxu0 %vm38_vm0, %v26_v4  ;;  %236 = vmatprep.mubr.msk.f32.mxu1 %vm38_vm0, %v30_v5 }
  0x18   :  { %231 = vmatmul.mubr.msk.f32.vlgmr.msra.gmra.mxu0 %vm38_vm0, %v27_v6  ;;  %237 = vmatmul.mubr.msk.f32.vlgmr.msra.gmra.mxu1 %vm38_vm0, %v31_v7 }
  0x19   :  { %233 = vmatprep.mubr.msk.f32.mxu0 %vm38_vm0, %v28_v8  ;;  %239 = vmatprep.mubr.msk.f32.mxu1 %vm38_vm0, %v32_v9 }
  0x1c   :  { %234 = vmatmul.mubr.msk.f32.gmra.mxu0 %vm38_vm0, %v29_v10  ;;  %240 = vmatmul.mubr.msk.f32.gmra.mxu1 %vm38_vm0, %v33_v11 }
  0xd8   :  { %v232_v12 = vpop.f32.mrf.mxu0  ;;  %v238_v13 = vpop.f32.mrf.mxu1 }
  0xd9   :  { %254 = vtanh.f32 %v232_v12 }
  0xda   :  { %256 = vtanh.f32 %v238_v13  ;;  %v129_v14 = vpop.f32.mrf.mxu0  ;;  %v149_v15 = vpop.f32.mrf.mxu1 }
  0xdb   :  { %258 = vtanh.f32 %v129_v14 }
  0xdc   :  { %260 = vtanh.f32 %v149_v15  ;;  %v235_v16 = vpop.f32.mrf.mxu0  ;;  %v241_v17 = vpop.f32.mrf.mxu1 }
  0xdd   :  { %262 = vtanh.f32 %v235_v16 }
  0xde   :  { %264 = vtanh.f32 %v241_v17  ;;  %v139_v18 = vpop.f32.mrf.mxu0  ;;  %v159_v19 = vpop.f32.mrf.mxu1 }
  0xdf   :  { %266 = vtanh.f32 %v139_v18 }
  0xe0   :  { %268 = vtanh.f32 %v159_v19 }
  0xe6   :  { %v255_v20 = vpop.eup %254 }
  0xe7   :  { %v257_v21 = vpop.eup %256  ;;  %178 = vst.msk [vmem:[#allocation5 + $0x8] sm:$0xff] %vm176_vm1, %v255_v20 }
  0xe8   :  { %v259_v22 = vpop.eup %258  ;;  %182 = vst.msk [vmem:[#allocation5 + $0x28] sm:$0xff] %vm176_vm1, %v257_v21 }
  0xe9   :  { %v261_v23 = vpop.eup %260  ;;  %177 = vst.msk [vmem:[#allocation5] sm:$0xff] %vm176_vm1, %v259_v22 }
  0xea   :  { %v263_v24 = vpop.eup %262  ;;  %181 = vst.msk [vmem:[#allocation5 + $0x20] sm:$0xff] %vm176_vm1, %v261_v23 }
  0xeb   :  { %v265_v25 = vpop.eup %264  ;;  %180 = vst.msk [vmem:[#allocation5 + $0x18] sm:$0xff] %vm176_vm1, %v263_v24 }
  0xec   :  { %v267_v26 = vpop.eup %266  ;;  %184 = vst.msk [vmem:[#allocation5 + $0x38] sm:$0xff] %vm176_vm1, %v265_v25 }
  0xed   :  { %v269_v27 = vpop.eup %268  ;;  %179 = vst.msk [vmem:[#allocation5 + $0x10] sm:$0xff] %vm176_vm1, %v267_v26 }
  0xee   :  { %183 = vst.msk [vmem:[#allocation5 + $0x30] sm:$0xff] %vm176_vm1, %v269_v27 }
  0xef   :  { %301 = shalt.err (!%p298_p9)
}
  0xf0   :  { %196 = dma.vmem_to_hbm [thread:$0]  %s191_s23, 1024, %s375_s2, [#allocation4], %s315_s12, %s315_s12, %s316_s13  }
  0xf1   :  { %312 = dma.done.wait [#allocation4], 1024  }
  0xf2   :  { %313 = vsyncadd [#allocation4], 4294966272 }
  0xf3   :  { %200 = vsyncpa [#allocation3], 1 }
  0xf4   :  { %201 = vsyncpa [#allocation4], 1 }

</bundles_post_ra>
